<compile_context>
chip_gen: v7x
topology: tpu7x:2x2x1
jax: 0.10.0
libtpu: 0.0.40
codegen_flags: <defaults>
</compile_context>

<pallas_src>
import functools

import jax
import jax.numpy as jnp
from jax import lax
from jax.experimental import pallas as pl
from jax.experimental.pallas import tpu as pltpu


def _round_up(x, m):
    return ((x + m - 1) // m) * m


def _vmem_capacity_bytes():
    try:
        return int(pltpu.get_tpu_info().vmem_capacity_bytes)
    except Exception:
        return 64 * 1024 * 1024  # conservative (v7x-sized) fallback


def _pick_tn(N, D, C, itemsize):
    """Largest row-tile that fits a generation-aware VMEM budget (<=1024 rows)."""
    budget = int(_vmem_capacity_bytes() * 0.6)           # headroom for Mosaic scratch
    resident = 2 * D * C * itemsize + 2 * 8 * 128 * 4    # emb^T (double-buffered) + out
    # per row: double-buffered feat + conf blocks, plus f32 in-kernel temporaries
    per_row = 2 * D * itemsize + 2 * C * itemsize + (4 * C + 2 * D) * 4
    tn = (budget - resident) // max(per_row, 1)
    if tn >= 128:
        tn = (tn // 128) * 128
    else:
        tn = max(8, (tn // 8) * 8)
    tn = min(1024, tn)
    tn = min(tn, _round_up(N, 8))
    return int(max(8, tn))


def _vmem_limit_bytes(tn, D, C, itemsize):
    est = (2 * tn * D * itemsize + 2 * tn * C * itemsize + 2 * D * C * itemsize
           + (4 * C + 2 * D) * tn * 4 + 2 * 8 * 128 * 4)
    cap = _vmem_capacity_bytes()
    return int(min(int(cap * 0.9), max(32 * 1024 * 1024, int(est * 1.5))))


def _semantic_loss_kernel(feat_ref, embt_ref, conf_ref, out_ref,
                          *, sigma, n_rows, tn):
    pid = pl.program_id(0)

    feat = feat_ref[...]                                   # [TN, D] (input dtype)
    embt = embt_ref[...]                                   # [D,  C] (input dtype)
    conf = conf_ref[...].astype(jnp.float32)               # [TN, C]

    # sim[n, c] = sum_d feat[n, d] * embT[d, c]  -> [TN, C]
    # MXU-native (lhs-last x rhs-first), f32 accumulation.
    sim = jnp.dot(feat, embt, preferred_element_type=jnp.float32)

    # weighted positive similarity per sample (reduce over classes)
    wps = jnp.sum(sim * conf, axis=1, keepdims=True)        # [TN, 1]

    # hinge = where(conf == 0, max(sigma - wps + sim, 0), 0)
    # == clamp((sigma - wps + sim*neg_mask) * neg_mask, min=0) of the reference.
    hinge = jnp.where(conf != 0.0, 0.0,
                      jnp.maximum(sigma - wps + sim, 0.0))  # [TN, C]

    per_sample = jnp.sum(hinge, axis=1, keepdims=True)       # [TN, 1]

    # Drop garbage rows of a partial last tile (NaN/Inf-safe).
    row = lax.broadcasted_iota(jnp.int32, per_sample.shape, 0) + pid * tn
    per_sample = jnp.where(row < n_rows, per_sample, 0.0)

    partial = jnp.sum(per_sample)                            # scalar f32

    # One aligned (8, 128) block per grid step; wrapper reads [i, 0, 0].
    out_ref[...] = jnp.full(out_ref.shape, partial, dtype=jnp.float32)


def semantic_loss(feature, class_embedding, batch_confidence, sigma):
    """Pallas TPU semantic_loss. Returns a scalar float32 loss."""
    N, D = feature.shape
    C, D2 = class_embedding.shape
    assert D == D2 and batch_confidence.shape == (N, C)

    itemsize = jnp.dtype(feature.dtype).itemsize
    TN = _pick_tn(N, D, C, itemsize)
    grid_n = pl.cdiv(N, TN)

    emb_t = class_embedding.T                                # [D, C] (tiny, one-time)

    kernel = functools.partial(
        _semantic_loss_kernel, sigma=float(sigma), n_rows=N, tn=TN)

    partials = pl.pallas_call(
        kernel,
        out_shape=jax.ShapeDtypeStruct((grid_n, 8, 128), jnp.float32),
        grid_spec=pltpu.PrefetchScalarGridSpec(
            num_scalar_prefetch=0,
            grid=(grid_n,),
            in_specs=[
                pl.BlockSpec((TN, D), lambda i: (i, 0)),     # feature: streams over N
                pl.BlockSpec((D, C), lambda i: (0, 0)),      # class_embedding^T: resident
                pl.BlockSpec((TN, C), lambda i: (i, 0)),     # confidence: natural layout
            ],
            out_specs=pl.BlockSpec((1, 8, 128), lambda i: (i, 0, 0)),
        ),
        compiler_params=pltpu.CompilerParams(
            dimension_semantics=("parallel",),
            vmem_limit_bytes=_vmem_limit_bytes(TN, D, C, itemsize),
        ),
        cost_estimate=pl.CostEstimate(
            flops=2 * N * C * D,
            transcendentals=0,
            bytes_accessed=(N * D + D * C + N * C) * itemsize + grid_n * 8 * 128 * 4,
        ),
    )(feature, emb_t, batch_confidence)

    # Final cross-tile reduction + mean over the true N in the wrapper.
    return jnp.sum(partials[:, 0, 0]) / N


def _reference(feature, class_embedding, batch_confidence, sigma):
    sim = feature @ class_embedding.T
    wps = jnp.sum(sim * batch_confidence, axis=1, keepdims=True)
    neg_mask = (batch_confidence == 0).astype(jnp.float32)
    neg_sim = sim * neg_mask
    hinge = jnp.maximum((sigma - wps + neg_sim) * neg_mask, 0.0)
    return jnp.mean(jnp.sum(hinge, axis=1))


def _make_inputs(key, N, D, C):
    k_feat, k_emb, k_cls, k_conf = jax.random.split(key, 4)
    feature = jax.random.normal(k_feat, (N, D), dtype=jnp.float32)
    class_embedding = jax.random.normal(k_emb, (C, D), dtype=jnp.float32)
    # one positive class per row (nonzero confidence), zeros elsewhere
    cls_idx = jax.random.randint(k_cls, (N,), 0, C)
    conf_val = jax.random.uniform(k_conf, (N,), minval=0.5, maxval=1.0)
    batch_confidence = (jax.nn.one_hot(cls_idx, C, dtype=jnp.float32)
                        * conf_val[:, None])
    return feature, class_embedding, batch_confidence


if __name__ == "__main__":
    sigma = 0.5
    key = jax.random.PRNGKey(0)
    k1, k2 = jax.random.split(key)

    # Small shapes consistent with the forward: N samples, D-dim features, C classes.
    feature, class_embedding, batch_confidence = _make_inputs(k1, 8, 32, 4)
    loss = semantic_loss(feature, class_embedding, batch_confidence, sigma)
    loss = jax.block_until_ready(loss)
    ref = _reference(feature, class_embedding, batch_confidence, sigma)
    assert jnp.allclose(loss, ref, rtol=1e-5, atol=1e-5), (loss, ref)

    # Exercise the unpadded / masked partial-tile path (N not 8-aligned).
    feature2, class_embedding2, batch_confidence2 = _make_inputs(k2, 13, 32, 4)
    loss2 = semantic_loss(feature2, class_embedding2, batch_confidence2, sigma)
    loss2 = jax.block_until_ready(loss2)
    ref2 = _reference(feature2, class_embedding2, batch_confidence2, sigma)
    assert jnp.allclose(loss2, ref2, rtol=1e-5, atol=1e-5), (loss2, ref2)

    # bf16 streaming path (halved HBM traffic): loose tolerance vs f32 math on
    # the same bf16-rounded inputs.
    f_bf = feature2.astype(jnp.bfloat16)
    e_bf = class_embedding2.astype(jnp.bfloat16)
    c_bf = batch_confidence2.astype(jnp.bfloat16)
    loss_bf = semantic_loss(f_bf, e_bf, c_bf, sigma)
    loss_bf = jax.block_until_ready(loss_bf)
    ref_bf = _reference(f_bf.astype(jnp.float32), e_bf.astype(jnp.float32),
                        c_bf.astype(jnp.float32), sigma)
    assert jnp.allclose(loss_bf, ref_bf, rtol=5e-2, atol=1e-1), (loss_bf, ref_bf)

    print("KERNEL_OK")
</pallas_src>

<mosaic_0001>
module attributes {stable_mosaic.version = 11 : i64} {
  func.func @_semantic_loss_kernel(%arg0: i32, %arg1: memref<8x32xf32, #tpu.memory_space<vmem>>, %arg2: memref<32x4xf32, #tpu.memory_space<vmem>>, %arg3: memref<8x4xf32, #tpu.memory_space<vmem>>, %arg4: memref<1x8x128xf32, #tpu.memory_space<vmem>>) attributes {dimension_semantics = [#tpu.dimension_semantics<parallel>], iteration_bounds = array<i64: 1>, scalar_prefetch = 0 : i64, scratch_operands = 0 : i64, tpu.core_type = #tpu.core_type<tc>, window_params = [{transform_indices = @transform_0, window_bounds = array<i64: 8, 32>}, {pipeline_mode = #tpu.pipeline_mode<synchronous>, transform_indices = @transform_1, window_bounds = array<i64: 32, 4>}, {transform_indices = @transform_2, window_bounds = array<i64: 8, 4>}, {transform_indices = @transform_3, window_bounds = array<i64: 1, 8, 128>}]} {
    %c0 = arith.constant 0 : index
    %c0_0 = arith.constant 0 : index
    %0 = vector.load %arg1[%c0, %c0_0] : memref<8x32xf32, #tpu.memory_space<vmem>>, vector<8x32xf32>
    %c0_1 = arith.constant 0 : index
    %c0_2 = arith.constant 0 : index
    %1 = vector.load %arg2[%c0_1, %c0_2] : memref<32x4xf32, #tpu.memory_space<vmem>>, vector<32x4xf32>
    %c0_3 = arith.constant 0 : index
    %c0_4 = arith.constant 0 : index
    %2 = vector.load %arg3[%c0_3, %c0_4] : memref<8x4xf32, #tpu.memory_space<vmem>>, vector<8x4xf32>
    %cst = arith.constant dense<0.000000e+00> : vector<8x4xf32>
    %3 = tpu.matmul %0, %1, %cst {dimension_numbers = #tpu.dot_dimension_numbers<[1], [0], [0], [1], [0, 0, 1, 1], [], []>} : vector<8x32xf32>, vector<32x4xf32>, vector<8x4xf32> -> vector<8x4xf32>
    %4 = arith.mulf %3, %2 : vector<8x4xf32>
    %cst_5 = arith.constant dense<0.000000e+00> : vector<8xf32>
    %5 = vector.multi_reduction <add>, %4, %cst_5 [1] : vector<8x4xf32> to vector<8xf32>
    %6 = vector.shape_cast %5 : vector<8xf32> to vector<8x1xf32>
    %cst_6 = arith.constant 0.000000e+00 : f32
    %7 = vector.broadcast %cst_6 : f32 to vector<8x4xf32>
    %8 = arith.cmpf one, %2, %7 : vector<8x4xf32>
    %cst_7 = arith.constant 5.000000e-01 : f32
    %9 = vector.broadcast %cst_7 : f32 to vector<8x1xf32>
    %10 = arith.subf %9, %6 : vector<8x1xf32>
    %11 = vector.broadcast %10 : vector<8x1xf32> to vector<8x4xf32>
    %12 = arith.addf %11, %3 : vector<8x4xf32>
    %cst_8 = arith.constant 0.000000e+00 : f32
    %13 = vector.broadcast %cst_8 : f32 to vector<8x4xf32>
    %14 = arith.maximumf %12, %13 : vector<8x4xf32>
    %cst_9 = arith.constant 0.000000e+00 : f32
    %15 = vector.broadcast %cst_9 : f32 to vector<8x4xf32>
    %16 = arith.select %8, %15, %14 : vector<8x4xi1>, vector<8x4xf32>
    %cst_10 = arith.constant dense<0.000000e+00> : vector<8xf32>
    %17 = vector.multi_reduction <add>, %16, %cst_10 [1] : vector<8x4xf32> to vector<8xf32>
    %18 = vector.shape_cast %17 : vector<8xf32> to vector<8x1xf32>
    %19 = tpu.iota {dimensions = array<i32: 0>} : vector<8x1xi32>
    %c8_i32 = arith.constant 8 : i32
    %20 = arith.muli %arg0, %c8_i32 : i32
    %21 = vector.broadcast %20 : i32 to vector<8x1xi32>
    %22 = arith.addi %19, %21 : vector<8x1xi32>
    %c8_i32_11 = arith.constant 8 : i32
    %23 = vector.broadcast %c8_i32_11 : i32 to vector<8x1xi32>
    %24 = arith.cmpi slt, %22, %23 : vector<8x1xi32>
    %cst_12 = arith.constant 0.000000e+00 : f32
    %25 = vector.broadcast %cst_12 : f32 to vector<8x1xf32>
    %26 = arith.select %24, %18, %25 : vector<8x1xi1>, vector<8x1xf32>
    %27 = vector.shape_cast %26 : vector<8x1xf32> to vector<1x8x1xf32>
    %cst_13 = arith.constant dense<0.000000e+00> : vector<1xf32>
    %28 = vector.multi_reduction <add>, %27, %cst_13 [1, 2] : vector<1x8x1xf32> to vector<1xf32>
    %29 = vector.shape_cast %28 : vector<1xf32> to vector<1x1x1xf32>
    %30 = vector.extract %29[0, 0, 0] : f32 from vector<1x1x1xf32>
    %31 = vector.broadcast %30 : f32 to vector<1x8x128xf32>
    %c0_14 = arith.constant 0 : index
    %c0_15 = arith.constant 0 : index
    %c0_16 = arith.constant 0 : index
    %32 = vector.load %arg4[%c0_14, %c0_15, %c0_16] : memref<1x8x128xf32, #tpu.memory_space<vmem>>, vector<1x8x128xf32>
    tpu.vector_store %arg4[%c0_14, %c0_15, %c0_16], %31 {strides = array<i32>} : memref<1x8x128xf32, #tpu.memory_space<vmem>>, vector<1x8x128xf32>,
    return
  }
  func.func @transform_0(%arg0: i32) -> (i32, i32) {
    %c0_i32 = arith.constant 0 : i32
    %c0_i32_0 = arith.constant 0 : i32
    return %arg0, %c0_i32 : i32, i32
  }
  func.func @transform_1(%arg0: i32) -> (i32, i32) {
    %c0_i32 = arith.constant 0 : i32
    %c0_i32_0 = arith.constant 0 : i32
    %c0_i32_1 = arith.constant 0 : i32
    return %c0_i32, %c0_i32_0 : i32, i32
  }
  func.func @transform_2(%arg0: i32) -> (i32, i32) {
    %c0_i32 = arith.constant 0 : i32
    %c0_i32_0 = arith.constant 0 : i32
    return %arg0, %c0_i32 : i32, i32
  }
  func.func @transform_3(%arg0: i32) -> (i32, i32, i32) {
    %c0_i32 = arith.constant 0 : i32
    %c0_i32_0 = arith.constant 0 : i32
    %c0_i32_1 = arith.constant 0 : i32
    return %arg0, %c0_i32, %c0_i32_0 : i32, i32, i32
  }
}

</mosaic_0001>

<bundles_post_ra>
// kernel: tpu_custom_call.1
= control target key start
LH: loop header
LB: loop body
LE: loop exit
PB: predicated region body
PF: predicated region fallthrough
CT: control target
= control target key end

     0   :  { %v195_v3 = vmov 0.0|0.0   ;;  %vm196_vm0 = vmmov 0   ;;  %v197_v6 = vmov 0.0   ;;  %s249_s0 = inlined_call_operand.vmem [shape: f32[8,32], index: 0, kind: input, shape index: {}]   ;;  %s250_s1 = inlined_call_operand.vmem [shape: f32[32,4], index: 1, kind: input, shape index: {}]   ;;  %s251_s2 = inlined_call_operand.vmem [shape: f32[8,4], index: 2, kind: input, shape index: {}]   ;;  %s252_s3 = inlined_call_operand.hbm [shape: f32[1,8,128], index: 3, kind: output, shape index: {}]  }
   0x1   :  { %v16_v0 = vld [vmem:[%s250_s1] sm:$0xff]  ;;  %v17_v1 = vld [vmem:[%s250_s1 + $0x8] sm:$0xff]  ;;  %v18_v2 = vld [vmem:[%s250_s1 + $0x10] sm:$0xff]  ;;  %159 = vmatprep.subr.bf16.mxu0 %v195_v3  ;;  %156 = vmatprep.mubr.msk.f32.mxu0 %vm196_vm0, %v197_v6 }
   0x2   :  { %v160_v4 = vpack.c.bf16 %v17_v1, %v16_v0  ;;  %v19_v5 = vld [vmem:[%s250_s1 + $0x18] sm:$0xff] }
   0x3   :  { %8 = vsyncpa [#allocation3], 0  ;;  %v163_v7 = vpack.c.bf16 %v19_v5, %v18_v2  ;;  %v15_v8 = vld [vmem:[%s249_s0] sm:$0xff]  ;;  %vm21_vm1 = vcmask 261120   ;;  %vm96_vm2 = vcmask 31744   ;;  %vm115_vm4 = vcmask 7168  }
   0x4   :  { %161 = vmatpush3.bf16.msra.mxu0 %v160_v4  ;;  %v20_v9 = vld [vmem:[%s251_s2] sm:$0xff]  ;;  %s198_s0 = smov [#allocation2]  }
   0x5   :  { %162 = vmatprep.subr.bf16.mxu0 %v195_v3  ;;  %vm100_vm3 = vcmp.ne.f32.partialorder %v20_v9, 0.0  ;;  %s134_s1 = sshll.u32 %s198_s0, 4  ;;  %s135_s1 = int_to_ptr.vmem [resolvable:$true] %s134_s1 }
   0x6   :  { %s171_s24 = scalar_lea.vmem %s135_s1, 128  ;;  %p176_p1 = scmp.lt.s32.totalorder %s135_s1, %s135_s1 }
   0x7   :  { %p172_p0 = scmp.ne.s32.totalorder %s135_s1, %s171_s24  ;;  %p177_p2 = scmp.lt.s32.totalorder %s171_s24, %s171_s24 }
   0x8   :  { %164 = vmatpush3.bf16.msra.mxu0 %v163_v7 }
   0x9   :  { %p178_p3 = por %p177_p2, %p176_p1 }
   0xb   :  { %157 = vmatmul.mubr.msk.f32.vlgmr.msra.gmra.mrb[0].mxu0 %vm21_vm1, %v15_v8  ;;  %p179_p4 = pnand %p178_p3, %p172_p0 }
  0xde   :  { %v91_v10 = vpop.f32.mrb[0].mxu0 }
  0xdf   :  { %v158_v11 = vpop.f32.mrb[1].mxu0  ;;  %v95_v12 = vmul.f32 %v91_v10, %v20_v9 }
  0xe1   :  { %v97_v13 = vsel %vm96_vm2, %v95_v12, 0.0 }
  0xe2   :  { %98 = vadd.xlane.f32.xlu0 %v97_v13 }
 0x16f   :  { %v99_v14 = vpop.xlane.xlu0 %98 }
 0x170   :  { %v101_v15 = vsub.f32 0.5, %v99_v14 }
 0x172   :  { %v102_v16 = vadd.f32 %v101_v15, %v91_v10 }
 0x174   :  { %v103_v17 = vmax.f32 %v102_v16, 0.0 }
 0x176   :  { %v104_v18 = vsel %vm100_vm3, 0.0, %v103_v17 }
 0x177   :  { %v105_v19 = vsel %vm96_vm2, %v104_v18, 0.0 }
 0x178   :  { %106 = vadd.xlane.f32.xlu0 %v105_v19 }
 0x205   :  { %v107_v20 = vpop.xlane.xlu0 %106 }
 0x206   :  { %v116_v21 = vsel %vm115_vm4, %v107_v20, 0.0 }
 0x207   :  { %117 = vadd.xlane.f32.xlu1 %v116_v21 }
 0x294   :  { %v118_v22 = vpop.xlane.xlu1 %117 }
 0x295   :  { %v119_v23 = vrot.slane %v118_v22, 4 }
 0x297   :  { %v120_v24 = vadd.f32 %v119_v23, %v118_v22 }
 0x299   :  { %v121_v25 = vrot.slane %v120_v24, 2 }
 0x29b   :  { %v122_v26 = vadd.f32 %v121_v25, %v120_v24 }
 0x29d   :  { %v123_v27 = vrot.slane %v122_v26, 1 }
 0x29f   :  { %v124_v28 = vadd.f32 %v123_v27, %v122_v26 }
 0x2a1   :  { %165 = vpush %v124_v28 }
 0x2d2   :  { %s166_s2 = spop %165 }
 0x2d3   :  { %v126_v29 = vstv %s166_s2 }
 0x2d4   :  { %127 = vst [vmem:[#allocation2] sm:$0xff] %v126_v29 }
 0x2d5   :  { %182 = shalt.err (!%p179_p4)
}
 0x2d6   :  { %s183_s27 = scalar_lea.hbm %s252_s3, 128 }
 0x2d7   :  { %p184_p5 = scmp.ne.s32.totalorder %s252_s3, %s183_s27  ;;  %p187_p6 = scmp.lt.u32.totalorder %s183_s27, %s252_s3 }
 0x2d9   :  { %p189_p7 = pnand %p187_p6, %p184_p5 }
 0x2db   :  { %192 = shalt.err (!%p189_p7)
}
 0x2dc   :  { %137 = dma.vmem_to_hbm [thread:$0]  %s135_s1, 128, %s252_s3, [#allocation3]  }
 0x2dd   :  { %193 = dma.done.wait [#allocation3], 128  }
 0x2de   :  { %194 = vsyncadd [#allocation3], 4294967168 }
 0x2df   :  { %141 = vsyncpa [#allocation3], 1 }

</bundles_post_ra>
